<compile_context>
chip_gen: v6e
topology: v6e:2x2x1
jax: 0.10.0
libtpu: 0.0.40
codegen_flags: <defaults>
</compile_context>

<pallas_src>
import functools

import jax
import jax.numpy as jnp
from jax.experimental import pallas as pl
from jax.experimental.pallas import tpu as pltpu


def _round_up(x, m):
    return ((x + m - 1) // m) * m


def dqn_kernel(x_ref, w1_ref, b1_ref, w2_ref, b2_ref, w3_ref, b3_ref, o_ref):
    # layer1 + ReLU (bf16 operands -> f32 accumulate, f32 elementwise)
    h1 = jnp.dot(x_ref[...], w1_ref[...], preferred_element_type=jnp.float32)
    h1 = jnp.maximum(h1 + b1_ref[...], 0.0)
    # layer2 + ReLU
    h2 = jnp.dot(h1.astype(w2_ref.dtype), w2_ref[...],
                 preferred_element_type=jnp.float32)
    h2 = jnp.maximum(h2 + b2_ref[...], 0.0)
    # layer3 (no activation), lane-dense padded output
    out = jnp.dot(h2.astype(w3_ref.dtype), w3_ref[...],
                  preferred_element_type=jnp.float32)
    o_ref[...] = (out + b3_ref[...]).astype(o_ref.dtype)


@functools.partial(jax.jit, static_argnames=("tile_b", "use_bf16"))
def dqn_forward(x, params, *, tile_b=256, use_bf16=True):
    """x: (B, n_obs) float32. params: dict of w1,b1,w2,b2,w3,b3 (f32, (in,out))."""
    w1, b1, w2, b2, w3, b3 = (
        params["w1"], params["b1"], params["w2"],
        params["b2"], params["w3"], params["b3"],
    )
    B, n_obs = x.shape
    hidden = w1.shape[1]
    n_actions = w3.shape[1]

    # --- lane-dense output: pad last layer to a multiple of 128 lanes ---
    n_out = _round_up(max(n_actions, 128), 128)
    if n_out != n_actions:
        w3 = jnp.pad(w3, ((0, 0), (0, n_out - n_actions)))
        b3 = jnp.pad(b3, ((0, 0), (0, n_out - n_actions)))

    # --- batch tiling: tile multiple of 16 (bf16 sublane), pad B to tile ---
    tb = min(tile_b, _round_up(B, 16))
    Bp = _round_up(B, tb)
    if Bp != B:
        x = jnp.pad(x, ((0, Bp - B), (0, 0)))

    # --- matmul operands to bf16 (f32 accumulation inside the kernel) ---
    mm_dtype = jnp.bfloat16 if use_bf16 else jnp.float32
    x_c = x.astype(mm_dtype)
    w1_c, w2_c, w3_c = (w.astype(mm_dtype) for w in (w1, w2, w3))
    b1_c, b2_c, b3_c = (b.astype(jnp.float32) for b in (b1, b2, b3))

    grid = (Bp // tb,)
    resident = lambda shape: pl.BlockSpec(shape, lambda i: (0, 0))

    flops = 2 * Bp * (n_obs * hidden + hidden * hidden + hidden * n_out)
    bytes_accessed = (
        x_c.size * x_c.dtype.itemsize
        + sum(a.size * a.dtype.itemsize
              for a in (w1_c, b1_c, w2_c, b2_c, w3_c, b3_c))
        + Bp * n_out * 4
    )

    out = pl.pallas_call(
        dqn_kernel,
        out_shape=jax.ShapeDtypeStruct((Bp, n_out), jnp.float32),
        grid=grid,
        in_specs=[
            pl.BlockSpec((tb, n_obs), lambda i: (i, 0)),   # x: tiled over batch
            resident((n_obs, hidden)), resident((1, hidden)),
            resident((hidden, hidden)), resident((1, hidden)),
            resident((hidden, n_out)), resident((1, n_out)),
        ],
        out_specs=pl.BlockSpec((tb, n_out), lambda i: (i, 0)),
        compiler_params=pltpu.CompilerParams(
            dimension_semantics=("parallel",),
            vmem_limit_bytes=32 * 1024 * 1024,
        ),
        cost_estimate=pl.CostEstimate(
            flops=flops, transcendentals=0, bytes_accessed=bytes_accessed),
    )(x_c, w1_c, b1_c, w2_c, b2_c, w3_c, b3_c)

    return out[:B, :n_actions]


def init_params(key, n_obs, n_actions, hidden=128):
    """Deterministic init matching nn.Linear's U(-1/sqrt(fan_in), 1/sqrt(fan_in))."""
    ks = jax.random.split(key, 6)

    def linear(kw, kb, fan_in, fan_out):
        bound = 1.0 / jnp.sqrt(fan_in)
        # stored as (in, out): transpose of PyTorch's (out, in)
        w = jax.random.uniform(kw, (fan_in, fan_out), jnp.float32, -bound, bound)
        b = jax.random.uniform(kb, (1, fan_out), jnp.float32, -bound, bound)
        return w, b

    w1, b1 = linear(ks[0], ks[1], n_obs, hidden)
    w2, b2 = linear(ks[2], ks[3], hidden, hidden)
    w3, b3 = linear(ks[4], ks[5], hidden, n_actions)
    return dict(w1=w1, b1=b1, w2=w2, b2=b2, w3=w3, b3=b3)


def reference_forward(x, p, use_bf16=True):
    """Reference with matching precision (bf16 matmul operands, f32 accumulate)."""
    cdt = jnp.bfloat16 if use_bf16 else jnp.float32
    h1 = jnp.dot(x.astype(cdt), p["w1"].astype(cdt),
                 preferred_element_type=jnp.float32) + p["b1"]
    h1 = jnp.maximum(h1, 0.0)
    h2 = jnp.dot(h1.astype(cdt), p["w2"].astype(cdt),
                 preferred_element_type=jnp.float32) + p["b2"]
    h2 = jnp.maximum(h2, 0.0)
    return jnp.dot(h2.astype(cdt), p["w3"].astype(cdt),
                   preferred_element_type=jnp.float32) + p["b3"]


def reference_forward_f32(x, p):
    h1 = jnp.maximum(x @ p["w1"] + p["b1"], 0.0)
    h2 = jnp.maximum(h1 @ p["w2"] + p["b2"], 0.0)
    return h2 @ p["w3"] + p["b3"]


if __name__ == "__main__":
    key = jax.random.PRNGKey(0)
    k_param, k_x = jax.random.split(key)

    B, n_obs, n_actions = 8, 4, 2  # small CartPole-like setup
    params = init_params(k_param, n_obs, n_actions, hidden=128)
    x = jax.random.normal(k_x, (B, n_obs), jnp.float32)

    out = dqn_forward(x, params)
    out = jax.block_until_ready(out)
    assert out.shape == (B, n_actions)

    # Tight check vs. precision-matched reference (bf16 operands, f32 accum).
    ref = reference_forward(x, params, use_bf16=True)
    assert jnp.allclose(out, ref, atol=1e-3, rtol=1e-3), "mismatch vs. matched ref"

    # Loose sanity check vs. full-f32 reference (bf16 rounding tolerance).
    ref32 = reference_forward_f32(x, params)
    assert jnp.allclose(out, ref32, atol=5e-2, rtol=5e-2), "mismatch vs. f32 ref"

    # Also exercise a ragged / larger batch to cover the padded-tile path.
    xb = jax.random.normal(k_x, (300, n_obs), jnp.float32)
    outb = jax.block_until_ready(dqn_forward(xb, params))
    refb = reference_forward(xb, params, use_bf16=True)
    assert outb.shape == (300, n_actions)
    assert jnp.allclose(outb, refb, atol=1e-3, rtol=1e-3), "mismatch (ragged batch)"

    print("KERNEL_OK")
</pallas_src>

<mosaic_0001>
module attributes {stable_mosaic.version = 11 : i64} {
  func.func @dqn_kernel(%arg0: i32, %arg1: memref<16x4xbf16, #tpu.memory_space<vmem>>, %arg2: memref<4x128xbf16, #tpu.memory_space<vmem>>, %arg3: memref<1x128xf32, #tpu.memory_space<vmem>>, %arg4: memref<128x128xbf16, #tpu.memory_space<vmem>>, %arg5: memref<1x128xf32, #tpu.memory_space<vmem>>, %arg6: memref<128x128xbf16, #tpu.memory_space<vmem>>, %arg7: memref<1x128xf32, #tpu.memory_space<vmem>>, %arg8: memref<16x128xf32, #tpu.memory_space<vmem>>) attributes {dimension_semantics = [#tpu.dimension_semantics<parallel>], iteration_bounds = array<i64: 1>, scalar_prefetch = 0 : i64, scratch_operands = 0 : i64, tpu.core_type = #tpu.core_type<tc>, window_params = [{transform_indices = @transform_0, window_bounds = array<i64: 16, 4>}, {pipeline_mode = #tpu.pipeline_mode<synchronous>, transform_indices = @transform_1, window_bounds = array<i64: 4, 128>}, {pipeline_mode = #tpu.pipeline_mode<synchronous>, transform_indices = @transform_2, window_bounds = array<i64: 1, 128>}, {pipeline_mode = #tpu.pipeline_mode<synchronous>, transform_indices = @transform_3, window_bounds = array<i64: 128, 128>}, {pipeline_mode = #tpu.pipeline_mode<synchronous>, transform_indices = @transform_4, window_bounds = array<i64: 1, 128>}, {pipeline_mode = #tpu.pipeline_mode<synchronous>, transform_indices = @transform_5, window_bounds = array<i64: 128, 128>}, {pipeline_mode = #tpu.pipeline_mode<synchronous>, transform_indices = @transform_6, window_bounds = array<i64: 1, 128>}, {transform_indices = @transform_7, window_bounds = array<i64: 16, 128>}]} {
    %c0 = arith.constant 0 : index
    %c0_0 = arith.constant 0 : index
    %0 = vector.load %arg1[%c0, %c0_0] : memref<16x4xbf16, #tpu.memory_space<vmem>>, vector<16x4xbf16>
    %c0_1 = arith.constant 0 : index
    %c0_2 = arith.constant 0 : index
    %1 = vector.load %arg2[%c0_1, %c0_2] : memref<4x128xbf16, #tpu.memory_space<vmem>>, vector<4x128xbf16>
    %cst = arith.constant dense<0.000000e+00> : vector<16x128xf32>
    %2 = tpu.matmul %0, %1, %cst {dimension_numbers = #tpu.dot_dimension_numbers<[1], [0], [0], [1], [0, 0, 1, 1], [], []>} : vector<16x4xbf16>, vector<4x128xbf16>, vector<16x128xf32> -> vector<16x128xf32>
    %c0_3 = arith.constant 0 : index
    %c0_4 = arith.constant 0 : index
    %3 = vector.load %arg3[%c0_3, %c0_4] : memref<1x128xf32, #tpu.memory_space<vmem>>, vector<1x128xf32>
    %4 = vector.broadcast %3 : vector<1x128xf32> to vector<16x128xf32>
    %5 = arith.addf %2, %4 : vector<16x128xf32>
    %cst_5 = arith.constant 0.000000e+00 : f32
    %6 = vector.broadcast %cst_5 : f32 to vector<16x128xf32>
    %7 = arith.maximumf %5, %6 : vector<16x128xf32>
    %8 = arith.truncf %7 : vector<16x128xf32> to vector<16x128xbf16>
    %c0_6 = arith.constant 0 : index
    %c0_7 = arith.constant 0 : index
    %9 = vector.load %arg4[%c0_6, %c0_7] : memref<128x128xbf16, #tpu.memory_space<vmem>>, vector<128x128xbf16>
    %cst_8 = arith.constant dense<0.000000e+00> : vector<16x128xf32>
    %10 = tpu.matmul %8, %9, %cst_8 {dimension_numbers = #tpu.dot_dimension_numbers<[1], [0], [0], [1], [0, 0, 1, 1], [], []>} : vector<16x128xbf16>, vector<128x128xbf16>, vector<16x128xf32> -> vector<16x128xf32>
    %c0_9 = arith.constant 0 : index
    %c0_10 = arith.constant 0 : index
    %11 = vector.load %arg5[%c0_9, %c0_10] : memref<1x128xf32, #tpu.memory_space<vmem>>, vector<1x128xf32>
    %12 = vector.broadcast %11 : vector<1x128xf32> to vector<16x128xf32>
    %13 = arith.addf %10, %12 : vector<16x128xf32>
    %cst_11 = arith.constant 0.000000e+00 : f32
    %14 = vector.broadcast %cst_11 : f32 to vector<16x128xf32>
    %15 = arith.maximumf %13, %14 : vector<16x128xf32>
    %16 = arith.truncf %15 : vector<16x128xf32> to vector<16x128xbf16>
    %c0_12 = arith.constant 0 : index
    %c0_13 = arith.constant 0 : index
    %17 = vector.load %arg6[%c0_12, %c0_13] : memref<128x128xbf16, #tpu.memory_space<vmem>>, vector<128x128xbf16>
    %cst_14 = arith.constant dense<0.000000e+00> : vector<16x128xf32>
    %18 = tpu.matmul %16, %17, %cst_14 {dimension_numbers = #tpu.dot_dimension_numbers<[1], [0], [0], [1], [0, 0, 1, 1], [], []>} : vector<16x128xbf16>, vector<128x128xbf16>, vector<16x128xf32> -> vector<16x128xf32>
    %c0_15 = arith.constant 0 : index
    %c0_16 = arith.constant 0 : index
    %19 = vector.load %arg7[%c0_15, %c0_16] : memref<1x128xf32, #tpu.memory_space<vmem>>, vector<1x128xf32>
    %20 = vector.broadcast %19 : vector<1x128xf32> to vector<16x128xf32>
    %21 = arith.addf %18, %20 : vector<16x128xf32>
    %c0_17 = arith.constant 0 : index
    %c0_18 = arith.constant 0 : index
    %22 = vector.load %arg8[%c0_17, %c0_18] : memref<16x128xf32, #tpu.memory_space<vmem>>, vector<16x128xf32>
    tpu.vector_store %arg8[%c0_17, %c0_18], %21 {strides = array<i32>} : memref<16x128xf32, #tpu.memory_space<vmem>>, vector<16x128xf32>,
    return
  }
  func.func @transform_0(%arg0: i32) -> (i32, i32) {
    %c0_i32 = arith.constant 0 : i32
    %c0_i32_0 = arith.constant 0 : i32
    return %arg0, %c0_i32 : i32, i32
  }
  func.func @transform_1(%arg0: i32) -> (i32, i32) {
    %c0_i32 = arith.constant 0 : i32
    %c0_i32_0 = arith.constant 0 : i32
    %c0_i32_1 = arith.constant 0 : i32
    return %c0_i32, %c0_i32_0 : i32, i32
  }
  func.func @transform_2(%arg0: i32) -> (i32, i32) {
    %c0_i32 = arith.constant 0 : i32
    %c0_i32_0 = arith.constant 0 : i32
    %c0_i32_1 = arith.constant 0 : i32
    return %c0_i32, %c0_i32_0 : i32, i32
  }
  func.func @transform_3(%arg0: i32) -> (i32, i32) {
    %c0_i32 = arith.constant 0 : i32
    %c0_i32_0 = arith.constant 0 : i32
    %c0_i32_1 = arith.constant 0 : i32
    return %c0_i32, %c0_i32_0 : i32, i32
  }
  func.func @transform_4(%arg0: i32) -> (i32, i32) {
    %c0_i32 = arith.constant 0 : i32
    %c0_i32_0 = arith.constant 0 : i32
    %c0_i32_1 = arith.constant 0 : i32
    return %c0_i32, %c0_i32_0 : i32, i32
  }
  func.func @transform_5(%arg0: i32) -> (i32, i32) {
    %c0_i32 = arith.constant 0 : i32
    %c0_i32_0 = arith.constant 0 : i32
    %c0_i32_1 = arith.constant 0 : i32
    return %c0_i32, %c0_i32_0 : i32, i32
  }
  func.func @transform_6(%arg0: i32) -> (i32, i32) {
    %c0_i32 = arith.constant 0 : i32
    %c0_i32_0 = arith.constant 0 : i32
    %c0_i32_1 = arith.constant 0 : i32
    return %c0_i32, %c0_i32_0 : i32, i32
  }
  func.func @transform_7(%arg0: i32) -> (i32, i32) {
    %c0_i32 = arith.constant 0 : i32
    %c0_i32_0 = arith.constant 0 : i32
    return %arg0, %c0_i32 : i32, i32
  }
}

</mosaic_0001>

<bundles_post_ra>
// kernel: dqn_forward.1
= control target key start
LH: loop header
LB: loop body
LE: loop exit
PB: predicated region body
PF: predicated region fallthrough
CT: control target
= control target key end

     0   :  { %vm46_vm0 = vcmask 1041408   ;;  %v433_v0 = vmov 0.0   ;;  %vm434_vm1 = vmmov 0   ;;  %vm42_vm2 = vcmask 31744   ;;  %s564_s1 = inlined_call_operand.vmem [shape: bf16[4,128], index: 1, kind: input, shape index: {}]   ;;  %s565_s0 = inlined_call_operand.vmem [shape: bf16[16,4], index: 0, kind: input, shape index: {}]   ;;  %s566_s3 = inlined_call_operand.vmem [shape: bf16[128,128], index: 3, kind: input, shape index: {}]   ;;  %s567_s5 = inlined_call_operand.vmem [shape: bf16[128,128], index: 5, kind: input, shape index: {}]   ;;  %s568_s2 = inlined_call_operand.vmem [shape: f32[1,128], index: 2, kind: input, shape index: {}]   ;;  %s569_s4 = inlined_call_operand.vmem [shape: f32[1,128], index: 4, kind: input, shape index: {}]   ;;  %s570_s6 = inlined_call_operand.vmem [shape: f32[1,128], index: 6, kind: input, shape index: {}]   ;;  %s571_s7 = inlined_call_operand.vmem [shape: f32[16,128], index: 7, kind: output, shape index: {}]  }
   0x1   :  { %368 = vmatprep.subr.bf16.mxu0 %v433_v0  ;;  %v29_v1 = vld [vmem:[%s564_s1] sm:$0x3]  ;;  %370 = vmatprep.mubr.msk.bf16.mxu0 %vm434_vm1, %v433_v0  ;;  %v417_v4 = vld [vmem:[%s566_s3 + $0x38] sm:$0xff]   ;;  %v418_v5 = vld [vmem:[%s566_s3 + $0x30] sm:$0xff]  }
   0x2   :  { %v48_v2 = vsel %vm46_vm0, %v29_v1, 0  ;;  %v416_v3 = vld [vmem:[%s565_s0] sm:$0xff]   ;;  %374 = vmatprep.subr.bf16.mxu1 %v433_v0  ;;  %390 = vmatprep.mubr.msk.bf16.mxu1 %vm434_vm1, %v433_v0  ;;  %v419_v6 = vld [vmem:[%s566_s3 + $0x28] sm:$0xff]   ;;  %v421_v8 = vld [vmem:[%s566_s3 + $0x18] sm:$0xff]  }
   0x3   :  { %369 = vmatpush3.bf16.msra.mxu0 %v48_v2  ;;  %375 = vmatpush3.bf16.msra.mxu1 %v417_v4  ;;  %v420_v7 = vld [vmem:[%s566_s3 + $0x20] sm:$0xff]   ;;  %v422_v9 = vld [vmem:[%s566_s3 + $0x10] sm:$0xff]   ;;  %v423_v10 = vld [vmem:[%s566_s3 + $0x8] sm:$0xff]  }
   0x4   :  { %394 = vmatprep.subr.bf16.mxu0 %v433_v0  ;;  %376 = vmatprep.subr.bf16.mxu1 %v433_v0  ;;  %v424_v11 = vld [vmem:[%s566_s3] sm:$0xff]   ;;  %v425_v12 = vld [vmem:[%s567_s5 + $0x38] sm:$0xff]   ;;  %v426_v13 = vld [vmem:[%s567_s5 + $0x30] sm:$0xff]  }
   0x5   :  { %v427_v14 = vld [vmem:[%s567_s5 + $0x28] sm:$0xff]   ;;  %v428_v15 = vld [vmem:[%s567_s5 + $0x20] sm:$0xff]   ;;  %v429_v16 = vld [vmem:[%s567_s5 + $0x18] sm:$0xff]  }
   0x6   :  { %371 = vmatmul.mubr.msk.bf16.vlgmr.msra.gmra.mxu0 %vm42_vm2, %v416_v3  ;;  %v327_v17 = vld [vmem:[%s568_s2] ss:$0 sm:$0xff]  ;;  %v430_v27 = vld [vmem:[%s567_s5 + $0x10] sm:$0xff]   ;;  %v431_v28 = vld [vmem:[%s567_s5 + $0x8] sm:$0xff]  }
   0x7   :  { %410 = vmatprep.mubr.msk.bf16.mxu0 %vm434_vm1, %v433_v0  ;;  %377 = vmatpush3.bf16.msra.mxu1 %v418_v5  ;;  %v432_v29 = vld [vmem:[%s567_s5] sm:$0xff]  }
   0x8   :  { %378 = vmatprep.subr.bf16.mxu1 %v433_v0  ;;  %395 = vmatpush3.bf16.msra.mxu0 %v425_v12  ;;  %v330_v30 = vld [vmem:[%s569_s4] ss:$0 sm:$0xff] }
   0x9   :  { %396 = vmatprep.subr.bf16.mxu0 %v433_v0  ;;  %v339_v40 = vld [vmem:[%s570_s6] ss:$0 sm:$0xff] }
   0xb   :  { %379 = vmatpush3.bf16.msra.mxu1 %v419_v6 }
   0xc   :  { %380 = vmatprep.subr.bf16.mxu1 %v433_v0  ;;  %397 = vmatpush3.bf16.msra.mxu0 %v426_v13 }
   0xd   :  { %398 = vmatprep.subr.bf16.mxu0 %v433_v0 }
   0xf   :  { %381 = vmatpush3.bf16.msra.mxu1 %v420_v7 }
  0x10   :  { %382 = vmatprep.subr.bf16.mxu1 %v433_v0  ;;  %399 = vmatpush3.bf16.msra.mxu0 %v427_v14 }
  0x11   :  { %400 = vmatprep.subr.bf16.mxu0 %v433_v0 }
  0x13   :  { %383 = vmatpush3.bf16.msra.mxu1 %v421_v8 }
  0x14   :  { %384 = vmatprep.subr.bf16.mxu1 %v433_v0  ;;  %401 = vmatpush3.bf16.msra.mxu0 %v428_v15 }
  0x15   :  { %402 = vmatprep.subr.bf16.mxu0 %v433_v0 }
  0x17   :  { %385 = vmatpush3.bf16.msra.mxu1 %v422_v9 }
  0x18   :  { %386 = vmatprep.subr.bf16.mxu1 %v433_v0  ;;  %403 = vmatpush3.bf16.msra.mxu0 %v429_v16 }
  0x19   :  { %404 = vmatprep.subr.bf16.mxu0 %v433_v0 }
  0x1b   :  { %387 = vmatpush3.bf16.msra.mxu1 %v423_v10 }
  0x1c   :  { %388 = vmatprep.subr.bf16.mxu1 %v433_v0  ;;  %405 = vmatpush3.bf16.msra.mxu0 %v430_v27 }
  0x1d   :  { %406 = vmatprep.subr.bf16.mxu0 %v433_v0 }
  0x1f   :  { %389 = vmatpush3.bf16.msra.mxu1 %v424_v11 }
  0x20   :  { %407 = vmatpush3.bf16.msra.mxu0 %v431_v28 }
  0x21   :  { %408 = vmatprep.subr.bf16.mxu0 %v433_v0 }
  0x24   :  { %409 = vmatpush3.bf16.msra.mxu0 %v432_v29 }
  0xc6   :  { %v84_v18 = vpop.f32.mrf.mxu0 }
  0xc7   :  { %v85_v20 = vadd.f32 %v327_v17, %v84_v18 }
  0xc8   :  { %v372_v19 = vpop.f32.mrf.mxu0 }
  0xc9   :  { %v91_v24 = vmax.f32 %v85_v20, 0.0 }
  0xca   :  { %v87_v21 = vpop.f32.mrf.mxu0 }
  0xcb   :  { %v88_v22 = vadd.f32 %v327_v17, %v87_v21 }
  0xcc   :  { %v373_v23 = vpop.f32.mrf.mxu0 }
  0xcd   :  { %v92_v25 = vmax.f32 %v88_v22, 0.0 }
  0xcf   :  { %v93_v26 = vpack.c.bf16 %v92_v25, %v91_v24 }
  0xd1   :  { %391 = vmatmul.mubr.bf16.vlgmr.msra.gmra.mxu1 %v93_v26 }
 0x191   :  { %v199_v31 = vpop.f32.mrf.mxu1 }
 0x192   :  { %v200_v33 = vadd.f32 %v330_v30, %v199_v31 }
 0x193   :  { %v392_v32 = vpop.f32.mrf.mxu1 }
 0x194   :  { %v206_v37 = vmax.f32 %v200_v33, 0.0 }
 0x195   :  { %v202_v34 = vpop.f32.mrf.mxu1 }
 0x196   :  { %v203_v35 = vadd.f32 %v330_v30, %v202_v34 }
 0x197   :  { %v393_v36 = vpop.f32.mrf.mxu1 }
 0x198   :  { %v207_v38 = vmax.f32 %v203_v35, 0.0 }
 0x19a   :  { %v208_v39 = vpack.c.bf16 %v207_v38, %v206_v37 }
 0x19c   :  { %411 = vmatmul.mubr.bf16.vlgmr.msra.gmra.mxu0 %v208_v39 }
 0x25c   :  { %v314_v41 = vpop.f32.mrf.mxu0 }
 0x25d   :  { %v315_v42 = vadd.f32 %v339_v40, %v314_v41 }
 0x25e   :  { %v412_v43 = vpop.f32.mrf.mxu0 }
 0x25f   :  { %321 = vst [vmem:[%s571_s7] sm:$0xff] %v315_v42 }
 0x260   :  { %v317_v44 = vpop.f32.mrf.mxu0 }
 0x261   :  { %v318_v45 = vadd.f32 %v339_v40, %v317_v44 }
 0x262   :  { %v413_v46 = vpop.f32.mrf.mxu0 }
 0x263   :  { %322 = vst [vmem:[%s571_s7 + $0x8] sm:$0xff] %v318_v45 }

</bundles_post_ra>
